<compile_context>
chip_gen: v7x
topology: tpu7x:2x2x1
jax: 0.10.0
libtpu: 0.0.40
codegen_flags: <defaults>
</compile_context>

<pallas_src>
import math

import jax
import jax.numpy as jnp
from jax.experimental import pallas as pl
from jax.experimental.pallas import tpu as pltpu

IN_FEATURES = 28 * 28   # 784
HIDDEN = 200            # logical hidden width (PyTorch)
HIDDEN_PAD = 256        # padded: full MXU tiles on v5e/v6e/v7x
OUT = 10                # logical logits width
OUT_PAD = 128           # padded: lane-dense unmasked stores
TILE_B = 2048           # cap on batch rows per grid step (working set with an
                        # f32 x double-buffer + resident bf16 weights + f32/bf16
                        # activation temporaries is ~25 MiB << 48 MiB budget)


def _round_up(x: int, m: int) -> int:
    return ((x + m - 1) // m) * m


def mlp_kernel(x_ref, w1_ref, b1_ref, w2_ref, b2_ref, w3_ref, b3_ref, out_ref):
    """One batch tile of relu(relu(x@W1+b1)@W2+b2)@W3+b3.

    x is cast to bf16 in-kernel (so the only HBM pass over x is the DMA of the
    tile itself); weights are bf16; the MXU accumulates in f32
    (preferred_element_type).  Bias add + ReLU stay f32 on the VPU (no native
    bf16 elementwise path on v5e); activations are cast back to bf16 only
    right before the next matmul.
    """
    x = x_ref[...].astype(jnp.bfloat16)                               # (TB, 784)
    h1 = jnp.dot(x, w1_ref[...], preferred_element_type=jnp.float32) + b1_ref[...]
    h1 = jnp.maximum(h1, 0.0).astype(jnp.bfloat16)                    # (TB, 256)
    h2 = jnp.dot(h1, w2_ref[...], preferred_element_type=jnp.float32) + b2_ref[...]
    h2 = jnp.maximum(h2, 0.0).astype(jnp.bfloat16)                    # (TB, 256)
    out = jnp.dot(h2, w3_ref[...], preferred_element_type=jnp.float32) + b3_ref[...]
    out_ref[...] = out.astype(out_ref.dtype)                          # (TB, 128) f32


def _pad_params(params):
    """Zero-pad weights/biases to lane-dense widths; weights -> bf16, biases stay f32."""
    (w1, b1), (w2, b2), (w3, b3) = params
    w1p = jnp.zeros((IN_FEATURES, HIDDEN_PAD), jnp.bfloat16)
    w1p = w1p.at[:, :HIDDEN].set(w1.astype(jnp.bfloat16))
    b1p = jnp.zeros((1, HIDDEN_PAD), jnp.float32).at[:, :HIDDEN].set(b1.reshape(1, -1))
    w2p = jnp.zeros((HIDDEN_PAD, HIDDEN_PAD), jnp.bfloat16)
    w2p = w2p.at[:HIDDEN, :HIDDEN].set(w2.astype(jnp.bfloat16))
    b2p = jnp.zeros((1, HIDDEN_PAD), jnp.float32).at[:, :HIDDEN].set(b2.reshape(1, -1))
    w3p = jnp.zeros((HIDDEN_PAD, OUT_PAD), jnp.bfloat16)
    w3p = w3p.at[:HIDDEN, :OUT].set(w3.astype(jnp.bfloat16))
    b3p = jnp.zeros((1, OUT_PAD), jnp.float32).at[:, :OUT].set(b3.reshape(1, -1))
    return w1p, b1p, w2p, b2p, w3p, b3p


def _choose_tile(batch: int, tile_cap: int) -> int:
    """Pick the batch-tile size.

    * batch <= 64: one block covering the whole array (block dim == array dim
      satisfies the (8,128) rule, no OOB masking, no padding).
    * otherwise: largest 8-multiple tile <= cap, but split into >= 2 grid
      steps so the "parallel" batch axis can shard across v7x's two TCs.
    Ragged last tiles are handled by Pallas (OOB reads are row-local garbage
    that is discarded because OOB writes are dropped).
    """
    if batch <= 64:
        return batch
    tile = min(tile_cap, _round_up(batch, 8))
    if pl.cdiv(batch, tile) < 2:
        tile = _round_up(-(-batch // 2), 8)
    return tile


def mlp_forward(x, params, *, tile_cap=TILE_B):
    """x: (B, 1, 28, 28) or (B, 784), f32 or bf16.  Returns (B, 10) float32 logits."""
    x2d = x.reshape(-1, IN_FEATURES)
    if x2d.dtype not in (jnp.float32, jnp.bfloat16):
        x2d = x2d.astype(jnp.float32)
    batch = x2d.shape[0]

    tile_b = _choose_tile(batch, tile_cap)
    n_tiles = pl.cdiv(batch, tile_b)

    w1p, b1p, w2p, b2p, w3p, b3p = _pad_params(params)

    const_map = lambda i: (0, 0)   # weights/biases: same block every step -> resident
    # NOTE: the six constant-index specs could also be single-buffered via
    # pipeline_mode=pl.Buffered(1); at tile_b <= 2048 the spare ~0.6 MiB buys
    # nothing, so we keep the portable default double-buffering.

    flops = 2 * batch * (IN_FEATURES * HIDDEN_PAD
                         + HIDDEN_PAD * HIDDEN_PAD
                         + HIDDEN_PAD * OUT_PAD)
    weight_bytes = 2 * (IN_FEATURES * HIDDEN_PAD
                        + HIDDEN_PAD * HIDDEN_PAD
                        + HIDDEN_PAD * OUT_PAD) + 4 * (2 * HIDDEN_PAD + OUT_PAD)
    bytes_accessed = (batch * IN_FEATURES * x2d.dtype.itemsize
                      + weight_bytes
                      + batch * OUT_PAD * 4)

    out_padded = pl.pallas_call(
        mlp_kernel,
        out_shape=jax.ShapeDtypeStruct((batch, OUT_PAD), jnp.float32),
        grid=(n_tiles,),
        in_specs=[
            pl.BlockSpec((tile_b, IN_FEATURES), lambda i: (i, 0)),   # streamed x tile
            pl.BlockSpec((IN_FEATURES, HIDDEN_PAD), const_map),      # W1 (resident)
            pl.BlockSpec((1, HIDDEN_PAD), const_map),                # b1
            pl.BlockSpec((HIDDEN_PAD, HIDDEN_PAD), const_map),       # W2
            pl.BlockSpec((1, HIDDEN_PAD), const_map),                # b2
            pl.BlockSpec((HIDDEN_PAD, OUT_PAD), const_map),          # W3
            pl.BlockSpec((1, OUT_PAD), const_map),                   # b3
        ],
        out_specs=pl.BlockSpec((tile_b, OUT_PAD), lambda i: (i, 0)),
        compiler_params=pltpu.CompilerParams(
            dimension_semantics=("parallel",),        # shard batch tiles across TCs (v7x)
            vmem_limit_bytes=48 * 1024 * 1024,        # 2048-row tile + f32 x dbl-buffer,
                                                      # still < v7x's 64 MiB physical
        ),
        cost_estimate=pl.CostEstimate(
            flops=flops, transcendentals=0, bytes_accessed=bytes_accessed),
    )(x2d, w1p, b1p, w2p, b2p, w3p, b3p)

    return out_padded[:, :OUT]


def init_linear_params(key, fan_in, fan_out):
    """Re-create nn.Linear's default init; weight stored (fan_in, fan_out) for y = x@W+b."""
    kw, kb = jax.random.split(key)
    bound = 1.0 / math.sqrt(fan_in)
    w = jax.random.uniform(kw, (fan_in, fan_out), jnp.float32, -bound, bound)
    b = jax.random.uniform(kb, (1, fan_out), jnp.float32, -bound, bound)
    return w, b


def init_mlp_params(key):
    k1, k2, k3 = jax.random.split(key, 3)
    return (
        init_linear_params(k1, IN_FEATURES, HIDDEN),
        init_linear_params(k2, HIDDEN, HIDDEN),
        init_linear_params(k3, HIDDEN, OUT),
    )


def _reference(xr, params, bf16_recipe):
    (w1, b1), (w2, b2), (w3, b3) = params
    if bf16_recipe:
        h1 = jnp.dot(xr.astype(jnp.bfloat16), w1.astype(jnp.bfloat16),
                     preferred_element_type=jnp.float32) + b1
        h1 = jnp.maximum(h1, 0.0).astype(jnp.bfloat16)
        h2 = jnp.dot(h1, w2.astype(jnp.bfloat16),
                     preferred_element_type=jnp.float32) + b2
        h2 = jnp.maximum(h2, 0.0).astype(jnp.bfloat16)
        return jnp.dot(h2, w3.astype(jnp.bfloat16),
                       preferred_element_type=jnp.float32) + b3
    h1 = jnp.maximum(xr @ w1 + b1, 0.0)
    h2 = jnp.maximum(h1 @ w2 + b2, 0.0)
    return h2 @ w3 + b3


if __name__ == "__main__":
    root = jax.random.PRNGKey(0)
    k_params, k_input = jax.random.split(root)

    params = init_mlp_params(k_params)

    # --- Small MNIST-like batch, NCHW as the PyTorch module would receive. ---
    x = jax.random.normal(k_input, (2, 1, 28, 28), dtype=jnp.float32)
    logits = mlp_forward(x, params)
    jax.block_until_ready(logits)

    assert logits.shape == (2, 10), logits.shape
    assert logits.dtype == jnp.float32, logits.dtype

    xr = x.reshape(-1, IN_FEATURES)
    # Tight check against the same bf16-in / f32-accumulate recipe.
    ref_bf16 = _reference(xr, params, bf16_recipe=True)
    assert jnp.allclose(logits, ref_bf16, atol=1e-3, rtol=1e-3), (
        jnp.max(jnp.abs(logits - ref_bf16)))
    # Loose check against the full-precision reference (bf16 matmul inputs).
    ref_f32 = _reference(xr, params, bf16_recipe=False)
    assert jnp.allclose(logits, ref_f32, atol=3e-2, rtol=3e-2), (
        jnp.max(jnp.abs(logits - ref_f32)))

    # --- Multi-tile + ragged-last-tile path (grid of 2, tail rows masked). ---
    xb = jax.random.normal(jax.random.PRNGKey(1), (200, 1, 28, 28), dtype=jnp.float32)
    logits_b = mlp_forward(xb, params, tile_cap=128)   # tiles: rows [0,128) and [128,200)
    jax.block_until_ready(logits_b)
    assert logits_b.shape == (200, 10), logits_b.shape

    xbr = xb.reshape(-1, IN_FEATURES)
    ref_b = _reference(xbr, params, bf16_recipe=True)
    assert jnp.allclose(logits_b, ref_b, atol=1e-3, rtol=1e-3), (
        jnp.max(jnp.abs(logits_b - ref_b)))

    print("KERNEL_OK")
</pallas_src>

<mosaic_0001>
module attributes {stable_mosaic.version = 11 : i64} {
  func.func @mlp_kernel(%arg0: i32, %arg1: memref<2x784xf32, #tpu.memory_space<vmem>>, %arg2: memref<784x256xbf16, #tpu.memory_space<vmem>>, %arg3: memref<1x256xf32, #tpu.memory_space<vmem>>, %arg4: memref<256x256xbf16, #tpu.memory_space<vmem>>, %arg5: memref<1x256xf32, #tpu.memory_space<vmem>>, %arg6: memref<256x128xbf16, #tpu.memory_space<vmem>>, %arg7: memref<1x128xf32, #tpu.memory_space<vmem>>, %arg8: memref<2x128xf32, #tpu.memory_space<vmem>>) attributes {dimension_semantics = [#tpu.dimension_semantics<parallel>], iteration_bounds = array<i64: 1>, scalar_prefetch = 0 : i64, scratch_operands = 0 : i64, tpu.core_type = #tpu.core_type<tc>, window_params = [{transform_indices = @transform_0, window_bounds = array<i64: 2, 784>}, {pipeline_mode = #tpu.pipeline_mode<synchronous>, transform_indices = @transform_1, window_bounds = array<i64: 784, 256>}, {pipeline_mode = #tpu.pipeline_mode<synchronous>, transform_indices = @transform_2, window_bounds = array<i64: 1, 256>}, {pipeline_mode = #tpu.pipeline_mode<synchronous>, transform_indices = @transform_3, window_bounds = array<i64: 256, 256>}, {pipeline_mode = #tpu.pipeline_mode<synchronous>, transform_indices = @transform_4, window_bounds = array<i64: 1, 256>}, {pipeline_mode = #tpu.pipeline_mode<synchronous>, transform_indices = @transform_5, window_bounds = array<i64: 256, 128>}, {pipeline_mode = #tpu.pipeline_mode<synchronous>, transform_indices = @transform_6, window_bounds = array<i64: 1, 128>}, {transform_indices = @transform_7, window_bounds = array<i64: 2, 128>}]} {
    %c0 = arith.constant 0 : index
    %c0_0 = arith.constant 0 : index
    %0 = vector.load %arg1[%c0, %c0_0] : memref<2x784xf32, #tpu.memory_space<vmem>>, vector<2x784xf32>
    %1 = arith.truncf %0 : vector<2x784xf32> to vector<2x784xbf16>
    %c0_1 = arith.constant 0 : index
    %c0_2 = arith.constant 0 : index
    %2 = vector.load %arg2[%c0_1, %c0_2] : memref<784x256xbf16, #tpu.memory_space<vmem>>, vector<784x256xbf16>
    %cst = arith.constant dense<0.000000e+00> : vector<2x256xf32>
    %3 = tpu.matmul %1, %2, %cst {dimension_numbers = #tpu.dot_dimension_numbers<[1], [0], [0], [1], [0, 0, 1, 1], [], []>} : vector<2x784xbf16>, vector<784x256xbf16>, vector<2x256xf32> -> vector<2x256xf32>
    %c0_3 = arith.constant 0 : index
    %c0_4 = arith.constant 0 : index
    %4 = vector.load %arg3[%c0_3, %c0_4] : memref<1x256xf32, #tpu.memory_space<vmem>>, vector<1x256xf32>
    %5 = vector.broadcast %4 : vector<1x256xf32> to vector<2x256xf32>
    %6 = arith.addf %3, %5 : vector<2x256xf32>
    %cst_5 = arith.constant 0.000000e+00 : f32
    %7 = vector.broadcast %cst_5 : f32 to vector<2x256xf32>
    %8 = arith.maximumf %6, %7 : vector<2x256xf32>
    %9 = arith.truncf %8 : vector<2x256xf32> to vector<2x256xbf16>
    %c0_6 = arith.constant 0 : index
    %c0_7 = arith.constant 0 : index
    %10 = vector.load %arg4[%c0_6, %c0_7] : memref<256x256xbf16, #tpu.memory_space<vmem>>, vector<256x256xbf16>
    %cst_8 = arith.constant dense<0.000000e+00> : vector<2x256xf32>
    %11 = tpu.matmul %9, %10, %cst_8 {dimension_numbers = #tpu.dot_dimension_numbers<[1], [0], [0], [1], [0, 0, 1, 1], [], []>} : vector<2x256xbf16>, vector<256x256xbf16>, vector<2x256xf32> -> vector<2x256xf32>
    %c0_9 = arith.constant 0 : index
    %c0_10 = arith.constant 0 : index
    %12 = vector.load %arg5[%c0_9, %c0_10] : memref<1x256xf32, #tpu.memory_space<vmem>>, vector<1x256xf32>
    %13 = vector.broadcast %12 : vector<1x256xf32> to vector<2x256xf32>
    %14 = arith.addf %11, %13 : vector<2x256xf32>
    %cst_11 = arith.constant 0.000000e+00 : f32
    %15 = vector.broadcast %cst_11 : f32 to vector<2x256xf32>
    %16 = arith.maximumf %14, %15 : vector<2x256xf32>
    %17 = arith.truncf %16 : vector<2x256xf32> to vector<2x256xbf16>
    %c0_12 = arith.constant 0 : index
    %c0_13 = arith.constant 0 : index
    %18 = vector.load %arg6[%c0_12, %c0_13] : memref<256x128xbf16, #tpu.memory_space<vmem>>, vector<256x128xbf16>
    %cst_14 = arith.constant dense<0.000000e+00> : vector<2x128xf32>
    %19 = tpu.matmul %17, %18, %cst_14 {dimension_numbers = #tpu.dot_dimension_numbers<[1], [0], [0], [1], [0, 0, 1, 1], [], []>} : vector<2x256xbf16>, vector<256x128xbf16>, vector<2x128xf32> -> vector<2x128xf32>
    %c0_15 = arith.constant 0 : index
    %c0_16 = arith.constant 0 : index
    %20 = vector.load %arg7[%c0_15, %c0_16] : memref<1x128xf32, #tpu.memory_space<vmem>>, vector<1x128xf32>
    %21 = vector.broadcast %20 : vector<1x128xf32> to vector<2x128xf32>
    %22 = arith.addf %19, %21 : vector<2x128xf32>
    %c0_17 = arith.constant 0 : index
    %c0_18 = arith.constant 0 : index
    %23 = vector.load %arg8[%c0_17, %c0_18] : memref<2x128xf32, #tpu.memory_space<vmem>>, vector<2x128xf32>
    tpu.vector_store %arg8[%c0_17, %c0_18], %22 {strides = array<i32>} : memref<2x128xf32, #tpu.memory_space<vmem>>, vector<2x128xf32>,
    return
  }
  func.func @transform_0(%arg0: i32) -> (i32, i32) {
    %c0_i32 = arith.constant 0 : i32
    %c0_i32_0 = arith.constant 0 : i32
    return %arg0, %c0_i32 : i32, i32
  }
  func.func @transform_1(%arg0: i32) -> (i32, i32) {
    %c0_i32 = arith.constant 0 : i32
    %c0_i32_0 = arith.constant 0 : i32
    %c0_i32_1 = arith.constant 0 : i32
    return %c0_i32, %c0_i32_0 : i32, i32
  }
  func.func @transform_2(%arg0: i32) -> (i32, i32) {
    %c0_i32 = arith.constant 0 : i32
    %c0_i32_0 = arith.constant 0 : i32
    %c0_i32_1 = arith.constant 0 : i32
    return %c0_i32, %c0_i32_0 : i32, i32
  }
  func.func @transform_3(%arg0: i32) -> (i32, i32) {
    %c0_i32 = arith.constant 0 : i32
    %c0_i32_0 = arith.constant 0 : i32
    %c0_i32_1 = arith.constant 0 : i32
    return %c0_i32, %c0_i32_0 : i32, i32
  }
  func.func @transform_4(%arg0: i32) -> (i32, i32) {
    %c0_i32 = arith.constant 0 : i32
    %c0_i32_0 = arith.constant 0 : i32
    %c0_i32_1 = arith.constant 0 : i32
    return %c0_i32, %c0_i32_0 : i32, i32
  }
  func.func @transform_5(%arg0: i32) -> (i32, i32) {
    %c0_i32 = arith.constant 0 : i32
    %c0_i32_0 = arith.constant 0 : i32
    %c0_i32_1 = arith.constant 0 : i32
    return %c0_i32, %c0_i32_0 : i32, i32
  }
  func.func @transform_6(%arg0: i32) -> (i32, i32) {
    %c0_i32 = arith.constant 0 : i32
    %c0_i32_0 = arith.constant 0 : i32
    %c0_i32_1 = arith.constant 0 : i32
    return %c0_i32, %c0_i32_0 : i32, i32
  }
  func.func @transform_7(%arg0: i32) -> (i32, i32) {
    %c0_i32 = arith.constant 0 : i32
    %c0_i32_0 = arith.constant 0 : i32
    return %arg0, %c0_i32 : i32, i32
  }
}

</mosaic_0001>

<bundles_post_ra>
// kernel: tpu_custom_call.1
= control target key start
LH: loop header
LB: loop body
LE: loop exit
PB: predicated region body
PF: predicated region fallthrough
CT: control target
= control target key end

     0   :  { %12 = vsyncpa [#allocation3], 0  ;;  %s2029_s0 = inlined_call_operand.hbm [shape: f32[2,784], index: 0, kind: input, shape index: {}]   ;;  %s2030_s1 = inlined_call_operand.hbm [shape: bf16[784,256], index: 1, kind: input, shape index: {}]   ;;  %s2031_s2 = inlined_call_operand.vmem [shape: f32[1,256], index: 2, kind: input, shape index: {}]   ;;  %s2032_s3 = inlined_call_operand.hbm [shape: bf16[256,256], index: 3, kind: input, shape index: {}]   ;;  %s2033_s4 = inlined_call_operand.vmem [shape: f32[1,256], index: 4, kind: input, shape index: {}]   ;;  %s2034_s5 = inlined_call_operand.hbm [shape: bf16[256,128], index: 5, kind: input, shape index: {}]   ;;  %s2035_s6 = inlined_call_operand.vmem [shape: f32[1,128], index: 6, kind: input, shape index: {}]   ;;  %s2036_s7 = inlined_call_operand.hbm [shape: f32[2,128], index: 7, kind: output, shape index: {}]  }
   0x1   :  { %13 = vsyncpa [#allocation6], 0 }
   0x2   :  { %14 = vsyncpa [#allocation9], 0 }
   0x3   :  { %15 = vsyncpa [#allocation4], 0  ;;  %s1870_s24 = smov [#allocation5]   ;;  %s1752_s28 = scalar_lea.hbm %s2030_s1, 12544 }
   0x4   :  { %s31_s25 = sshll.u32 %s1870_s24, 4  ;;  %p1753_p0 = scmp.ne.s32.totalorder %s2030_s1, %s1752_s28  ;;  %s32_s25 = int_to_ptr.vmem [resolvable:$true] %s31_s25 }
   0x5   :  { %p1756_p1 = scmp.lt.u32.totalorder %s1752_s28, %s2030_s1 }
   0x7   :  { %p1758_p2 = pnand %p1756_p1, %p1753_p0 }
   0x9   :  { %1761 = shalt.err (!%p1758_p2)
}
   0xa   :  { %s1762_s10 = scalar_lea.vmem %s32_s25, 12544  ;;  %p1767_p4 = scmp.lt.s32.totalorder %s32_s25, %s32_s25 }
   0xb   :  { %p1763_p3 = scmp.ne.s32.totalorder %s32_s25, %s1762_s10  ;;  %p1768_p5 = scmp.lt.s32.totalorder %s1762_s10, %s1762_s10 }
   0xd   :  { %p1769_p6 = por %p1768_p5, %p1767_p4 }
   0xf   :  { %p1770_p7 = pnand %p1769_p6, %p1763_p3 }
  0x11   :  { %1773 = shalt.err (!%p1770_p7)
}
  0x12   :  { %s1871_s11 = smov 128   ;;  %s1872_s12 = smov 8  }
  0x13   :  { %37 = dma.hbm_to_vmem [thread:$0]  %s2030_s1, 12544, %s32_s25, [#allocation6], %s1871_s11, %s1871_s11, %s1872_s12  }
  0x14   :  { %s1873_s15 = smov [#allocation2]   ;;  %s1874_s17 = smov [#allocation7]  }
  0x15   :  { %s22_s16 = sshll.u32 %s1873_s15, 4  ;;  %s45_s18 = sshll.u32 %s1874_s17, 4  ;;  %s23_s16 = int_to_ptr.vmem [resolvable:$true] %s22_s16  ;;  %s46_s18 = int_to_ptr.vmem [resolvable:$true] %s45_s18 }
  0x16   :  { %s1774_s21 = scalar_lea.hbm %s2029_s0, 224 }
  0x17   :  { %p1775_p8 = scmp.ne.s32.totalorder %s2029_s0, %s1774_s21  ;;  %p1778_p9 = scmp.lt.u32.totalorder %s1774_s21, %s2029_s0 }
  0x19   :  { %p1780_p10 = pnand %p1778_p9, %p1775_p8 }
  0x1b   :  { %1783 = shalt.err (!%p1780_p10)
}
  0x1c   :  { %s1784_s1 = scalar_lea.vmem %s23_s16, 224  ;;  %p1789_p12 = scmp.lt.s32.totalorder %s23_s16, %s23_s16 }
  0x1d   :  { %p1785_p11 = scmp.ne.s32.totalorder %s23_s16, %s1784_s1  ;;  %p1790_p13 = scmp.lt.s32.totalorder %s1784_s1, %s1784_s1 }
  0x1f   :  { %p1791_p0 = por %p1790_p13, %p1789_p12 }
  0x21   :  { %p1792_p1 = pnand %p1791_p0, %p1785_p11 }
  0x23   :  { %1795 = shalt.err (!%p1792_p1)
}
  0x24   :  { %25 = dma.hbm_to_vmem [thread:$0]  %s2029_s0, 224, %s23_s16, [#allocation3]  }
  0x25   :  { %s1796_s30 = scalar_lea.hbm %s2032_s3, 4096 }
  0x26   :  { %p1797_p2 = scmp.ne.s32.totalorder %s2032_s3, %s1796_s30  ;;  %p1800_p3 = scmp.lt.u32.totalorder %s1796_s30, %s2032_s3 }
  0x28   :  { %p1802_p4 = pnand %p1800_p3, %p1797_p2 }
  0x2a   :  { %1805 = shalt.err (!%p1802_p4)
}
  0x2b   :  { %s1806_s14 = scalar_lea.vmem %s46_s18, 4096  ;;  %p1811_p6 = scmp.lt.s32.totalorder %s46_s18, %s46_s18 }
  0x2c   :  { %p1807_p5 = scmp.ne.s32.totalorder %s46_s18, %s1806_s14  ;;  %p1812_p7 = scmp.lt.s32.totalorder %s1806_s14, %s1806_s14 }
  0x2e   :  { %p1813_p8 = por %p1812_p7, %p1811_p6 }
  0x30   :  { %p1814_p9 = pnand %p1813_p8, %p1807_p5 }
  0x32   :  { %1817 = shalt.err (!%p1814_p9)
}
  0x33   :  { %51 = dma.hbm_to_vmem [thread:$0]  %s2032_s3, 4096, %s46_s18, [#allocation6], %s1871_s11, %s1871_s11, %s1872_s12  }
  0x34   :  { %s1875_s16 = smov [#allocation8]   ;;  %s1818_s21 = scalar_lea.hbm %s2034_s5, 2048 }
  0x35   :  { %s59_s17 = sshll.u32 %s1875_s16, 4  ;;  %p1819_p10 = scmp.ne.s32.totalorder %s2034_s5, %s1818_s21  ;;  %s60_s17 = int_to_ptr.vmem [resolvable:$true] %s59_s17 }
  0x36   :  { %p1822_p11 = scmp.lt.u32.totalorder %s1818_s21, %s2034_s5 }
  0x38   :  { %p1824_p12 = pnand %p1822_p11, %p1819_p10 }
  0x3a   :  { %1827 = shalt.err (!%p1824_p12)
}
  0x3b   :  { %s1828_s1 = scalar_lea.vmem %s60_s17, 2048  ;;  %p1833_p0 = scmp.lt.s32.totalorder %s60_s17, %s60_s17 }
  0x3c   :  { %p1829_p13 = scmp.ne.s32.totalorder %s60_s17, %s1828_s1  ;;  %p1834_p1 = scmp.lt.s32.totalorder %s1828_s1, %s1828_s1 }
  0x3e   :  { %p1835_p2 = por %p1834_p1, %p1833_p0 }
  0x40   :  { %p1836_p3 = pnand %p1835_p2, %p1829_p13 }
  0x42   :  { %1839 = shalt.err (!%p1836_p3)
}
  0x43   :  { %s1876_s3 = smov 64   ;;  %s1877_s11 = smov 4  }
  0x44   :  { %65 = dma.hbm_to_vmem [thread:$0]  %s2034_s5, 2048, %s60_s17, [#allocation9], %s1876_s3, %s1876_s3, %s1877_s11  }
  0x45   :  { %1862 = dma.done.wait [#allocation3], 224  }
  0x46   :  { %1863 = vsyncadd [#allocation3], 4294967072 }
  0x47   :  { %1864 = dma.done.wait [#allocation6], 16640  }
  0x48   :  { %1865 = vsyncadd [#allocation6], 4294950656 }
  0x49   :  { %1866 = dma.done.wait [#allocation9], 2048  }
  0x4a   :  { %1867 = vsyncadd [#allocation9], 4294965248  ;;  %v1539_v0 = vld [vmem:[#allocation5 + $0x104] ss:$8 sps:$4 sm:$0xff]   ;;  %v1541_v1 = vld [vmem:[#allocation5 + $0x100] ss:$8 sps:$4 sm:$0xff]   ;;  %v89_v11 = vlaneseq }
  0x4b   :  { %777 = vmatprep.subr.bf16.mxu0 %v1539_v0  ;;  %v1542_v2 = vld [vmem:[#allocation5 + $0x114] ss:$8 sps:$4 sm:$0xff]   ;;  %v1544_v3 = vld [vmem:[#allocation5 + $0x110] ss:$8 sps:$4 sm:$0xff]   ;;  %v1545_v4 = vld [vmem:[#allocation5 + $0x124] ss:$8 sps:$4 sm:$0xff]  }
  0x4c   :  { %778 = vmatpush1.bf16.msra.mxu0 %v1541_v1  ;;  %v1547_v5 = vld [vmem:[#allocation5 + $0x120] ss:$8 sps:$4 sm:$0xff]   ;;  %v1548_v6 = vld [vmem:[#allocation5 + $0x134] ss:$8 sps:$4 sm:$0xff]   ;;  %v1550_v7 = vld [vmem:[#allocation5 + $0x130] ss:$8 sps:$4 sm:$0xff]  }
  0x4d   :  { %779 = vmatprep.subr.bf16.mxu0 %v1542_v2  ;;  %v1551_v8 = vld [vmem:[#allocation5 + $0x144] ss:$8 sps:$4 sm:$0xff]   ;;  %v1878_v9 = vmov 1983009808   ;;  %v1553_v12 = vld [vmem:[#allocation5 + $0x140] ss:$8 sps:$4 sm:$0xff]  }
  0x4e   :  { %v87_v10 = vunpack.c.l.s4 %v1878_v9  ;;  %v1554_v13 = vld [vmem:[#allocation5 + $0x154] ss:$8 sps:$4 sm:$0xff]   ;;  %v1975_v15 = vshrl.u32 %v89_v11, 7  ;;  %v1556_v16 = vld [vmem:[#allocation5 + $0x150] ss:$8 sps:$4 sm:$0xff]   ;;  %vm732_vm0 = vcmask 130048  }
  0x4f   :  { %v1557_v17 = vld [vmem:[#allocation5 + $0x164] ss:$8 sps:$4 sm:$0xff]   ;;  %v81_v19 = vld [vmem:[#allocation2] sm:$0xff]  ;;  %v1559_v22 = vld [vmem:[#allocation5 + $0x160] ss:$8 sps:$4 sm:$0xff]  }
  0x50   :  { %780 = vmatpush1.bf16.msra.mxu0 %v1544_v3  ;;  %v88_v14 = vunpack.c.0.s8 %v87_v10  ;;  %v85_v20 = vcombine.high %v81_v19, %v81_v19  ;;  %v1560_v23 = vld [vmem:[#allocation5 + $0x174] ss:$8 sps:$4 sm:$0xff]   ;;  %v1594_v26 = vld [vmem:[#allocation5 + $0x4] ss:$8 sps:$4 sm:$0xff]   ;;  %v1562_v27 = vld [vmem:[#allocation5 + $0x170] ss:$8 sps:$4 sm:$0xff]  }
  0x51   :  { %781 = vmatprep.subr.bf16.mxu0 %v1545_v4  ;;  %v1599_v29 = vld [vmem:[#allocation5] ss:$8 sps:$4 sm:$0xff]   ;;  %736 = vmatprep.subr.bf16.mxu1 %v1594_v26  ;;  %v1600_v31 = vld [vmem:[#allocation5 + $0x14] ss:$8 sps:$4 sm:$0xff]   ;;  %v1563_v32 = vld [vmem:[#allocation5 + $0x184] ss:$8 sps:$4 sm:$0xff]  }
  0x52   :  { %v1978_v18 = vsub.s32 %v88_v14, %v1975_v15  ;;  %737 = vmatpush1.bf16.msra.mxu1 %v1599_v29  ;;  %v1605_v34 = vld [vmem:[#allocation5 + $0x10] ss:$8 sps:$4 sm:$0xff]   ;;  %v1606_v35 = vld [vmem:[#allocation5 + $0x24] ss:$8 sps:$4 sm:$0xff]   ;;  %v1565_v36 = vld [vmem:[#allocation5 + $0x180] ss:$8 sps:$4 sm:$0xff]  }
  0x53   :  { %738 = vmatprep.subr.bf16.mxu1 %v1600_v31  ;;  %v1566_v37 = vld [vmem:[#allocation5 + $0x194] ss:$8 sps:$4 sm:$0xff]   ;;  %v1611_v38 = vld [vmem:[#allocation5 + $0x20] ss:$8 sps:$4 sm:$0xff]   ;;  %v1568_v40 = vld [vmem:[#allocation5 + $0x190] ss:$8 sps:$4 sm:$0xff]  }
  0x54   :  { %782 = vmatpush1.bf16.msra.mxu0 %v1547_v5  ;;  %v1981_v21 = vrot.slane %v81_v19, %v1978_v18  ;;  %v1984_v24 = vrot.slane %v85_v20, %v1978_v18  ;;  %v1612_v39 = vld [vmem:[#allocation5 + $0x34] ss:$8 sps:$4 sm:$0xff]   ;;  %v1569_v41 = vld [vmem:[#allocation5 + $0x1a4] ss:$8 sps:$4 sm:$0xff]   ;;  %v1617_v42 = vld [vmem:[#allocation5 + $0x30] ss:$8 sps:$4 sm:$0xff]  }
  0x55   :  { %783 = vmatprep.subr.bf16.mxu0 %v1548_v6  ;;  %v1618_v43 = vld [vmem:[#allocation5 + $0x44] ss:$8 sps:$4 sm:$0xff]   ;;  %v1571_v44 = vld [vmem:[#allocation5 + $0x1a0] ss:$8 sps:$4 sm:$0xff]   ;;  %v1572_v45 = vld [vmem:[#allocation5 + $0x1b4] ss:$8 sps:$4 sm:$0xff]  }
  0x56   :  { %v100_v25 = vcombine.high %v1981_v21, %v1981_v21  ;;  %v101_v28 = vcombine.high %v1984_v24, %v1984_v24  ;;  %739 = vmatpush1.bf16.msra.mxu1 %v1605_v34  ;;  %v1623_v46 = vld [vmem:[#allocation5 + $0x40] ss:$8 sps:$4 sm:$0xff]   ;;  %v1624_v47 = vld [vmem:[#allocation5 + $0x54] ss:$8 sps:$4 sm:$0xff]   ;;  %v1574_v48 = vld [vmem:[#allocation5 + $0x1b0] ss:$8 sps:$4 sm:$0xff]   ;;  %v127_v5 = vpack.c.bf16 %v1984_v24, %v1984_v24 }
  0x57   :  { %740 = vmatprep.subr.bf16.mxu1 %v1606_v35  ;;  %v1575_v49 = vld [vmem:[#allocation5 + $0x1c4] ss:$8 sps:$4 sm:$0xff]   ;;  %v1629_v50 = vld [vmem:[#allocation5 + $0x50] ss:$8 sps:$4 sm:$0xff]   ;;  %v1577_v52 = vld [vmem:[#allocation5 + $0x1c0] ss:$8 sps:$4 sm:$0xff]  }
  0x58   :  { %784 = vmatpush1.bf16.msra.mxu0 %v1550_v7  ;;  %v126_v30 = vpack.c.bf16 %v100_v25, %v100_v25  ;;  %v128_v33 = vpack.c.bf16 %v101_v28, %v101_v28  ;;  %v1630_v51 = vld [vmem:[#allocation5 + $0x64] ss:$8 sps:$4 sm:$0xff]   ;;  %v1578_v53 = vld [vmem:[#allocation5 + $0x1d4] ss:$8 sps:$4 sm:$0xff]   ;;  %v1635_v54 = vld [vmem:[#allocation5 + $0x60] ss:$8 sps:$4 sm:$0xff]  }
  0x59   :  { %785 = vmatprep.subr.bf16.mxu0 %v1551_v8  ;;  %v1636_v55 = vld [vmem:[#allocation5 + $0x74] ss:$8 sps:$4 sm:$0xff]   ;;  %v1580_v56 = vld [vmem:[#allocation5 + $0x1d0] ss:$8 sps:$4 sm:$0xff]   ;;  %v1581_v57 = vld [vmem:[#allocation5 + $0x1e4] ss:$8 sps:$4 sm:$0xff]  }
  0x5a   :  { %768 = vmatprep.mubr.bf16.mxu1 %v126_v30  ;;  %809 = vmatprep.mubr.bf16.mxu0 %v128_v33  ;;  %v1641_v58 = vld [vmem:[#allocation5 + $0x70] ss:$8 sps:$4 sm:$0xff]   ;;  %v1642_v59 = vld [vmem:[#allocation5 + $0x84] ss:$8 sps:$4 sm:$0xff]   ;;  %v1583_v60 = vld [vmem:[#allocation5 + $0x1e0] ss:$8 sps:$4 sm:$0xff]  }
  0x5b   :  { %741 = vmatpush1.bf16.msra.mxu1 %v1611_v38  ;;  %v1584_v61 = vld [vmem:[#allocation5 + $0x1f4] ss:$8 sps:$4 sm:$0xff]   ;;  %v1647_v62 = vld [vmem:[#allocation5 + $0x80] ss:$8 sps:$4 sm:$0xff]   ;;  %v1586_v0 = vld [vmem:[#allocation5 + $0x1f0] ss:$8 sps:$4 sm:$0xff]  }
  0x5c   :  { %786 = vmatpush1.bf16.msra.mxu0 %v1553_v12  ;;  %742 = vmatprep.subr.bf16.mxu1 %v1612_v39  ;;  %v1648_v63 = vld [vmem:[#allocation5 + $0x94] ss:$8 sps:$4 sm:$0xff]   ;;  %v1590_v1 = vld [vmem:[#allocation5 + $0x204] ss:$8 sps:$4 sm:$0xff]   ;;  %v1653_v2 = vld [vmem:[#allocation5 + $0x90] ss:$8 sps:$4 sm:$0xff]  }
  0x5d   :  { %787 = vmatprep.subr.bf16.mxu0 %v1554_v13  ;;  %v1654_v3 = vld [vmem:[#allocation5 + $0xa4] ss:$8 sps:$4 sm:$0xff]   ;;  %v82_v4 = vld [vmem:[#allocation2 + $0x8] sm:$0x3f]  ;;  %v1588_v8 = vld [vmem:[#allocation5 + $0x200] ss:$8 sps:$4 sm:$0xff]  }
  0x5e   :  { %v102_v6 = vcombine.high %v82_v4, %v82_v4  ;;  %v1993_v7 = vrot.slane %v82_v4, %v1978_v18  ;;  %v1593_v9 = vld [vmem:[#allocation5 + $0x214] ss:$8 sps:$4 sm:$0xff]   ;;  %v1659_v10 = vld [vmem:[#allocation5 + $0xa0] ss:$8 sps:$4 sm:$0xff]   ;;  %v1665_v19 = vld [vmem:[#allocation5 + $0xb0] ss:$8 sps:$4 sm:$0xff]  }
  0x5f   :  { %743 = vmatpush1.bf16.msra.mxu1 %v1617_v42  ;;  %v1660_v13 = vld [vmem:[#allocation5 + $0xb4] ss:$8 sps:$4 sm:$0xff]   ;;  %v1666_v20 = vld [vmem:[#allocation5 + $0xc4] ss:$8 sps:$4 sm:$0xff]   ;;  %v1602_v25 = vld [vmem:[#allocation5 + $0x230] ss:$8 sps:$4 sm:$0xff]  }
  0x60   :  { %788 = vmatpush1.bf16.msra.mxu0 %v1556_v16  ;;  %744 = vmatprep.subr.bf16.mxu1 %v1618_v43  ;;  %v1996_v11 = vrot.slane %v102_v6, %v1978_v18  ;;  %v117_v12 = vcombine.high %v1993_v7, %v1993_v7  ;;  %v1591_v16 = vld [vmem:[#allocation5 + $0x210] ss:$8 sps:$4 sm:$0xff]   ;;  %v1604_v18 = vld [vmem:[#allocation5 + $0x234] ss:$8 sps:$4 sm:$0xff]   ;;  %v1610_v26 = vld [vmem:[#allocation5 + $0x244] ss:$8 sps:$4 sm:$0xff]  }
  0x61   :  { %789 = vmatprep.subr.bf16.mxu0 %v1557_v17  ;;  %v1598_v17 = vld [vmem:[#allocation5 + $0x224] ss:$8 sps:$4 sm:$0xff]   ;;  %v1672_v24 = vld [vmem:[#allocation5 + $0xd4] ss:$8 sps:$4 sm:$0xff]   ;;  %v1608_v29 = vld [vmem:[#allocation5 + $0x240] ss:$8 sps:$4 sm:$0xff]  }
  0x62   :  { %v130_v14 = vpack.c.bf16 %v117_v12, %v117_v12  ;;  %v1679_v28 = vld [vmem:[#allocation5 + $0xe4] ss:$8 sps:$4 sm:$0xff]   ;;  %v1616_v30 = vld [vmem:[#allocation5 + $0x254] ss:$8 sps:$4 sm:$0xff]   ;;  %v1684_v31 = vld [vmem:[#allocation5 + $0xe0] ss:$8 sps:$4 sm:$0xff]  }
  0x63   :  { %745 = vmatpush1.bf16.msra.mxu1 %v1623_v46  ;;  %v1685_v33 = vld [vmem:[#allocation5 + $0xf4] ss:$8 sps:$4 sm:$0xff]   ;;  %v1622_v34 = vld [vmem:[#allocation5 + $0x264] ss:$8 sps:$4 sm:$0xff]   ;;  %v1687_v35 = vld [vmem:[#allocation5 + $0xf0] ss:$8 sps:$4 sm:$0xff]  }
  0x64   :  { %790 = vmatpush1.bf16.msra.mxu0 %v1559_v22  ;;  %746 = vmatprep.subr.bf16.mxu1 %v1624_v47  ;;  %v1596_v22 = vld [vmem:[#allocation5 + $0x220] ss:$8 sps:$4 sm:$0xff]   ;;  %v1628_v38 = vld [vmem:[#allocation5 + $0x274] ss:$8 sps:$4 sm:$0xff]   ;;  %v1688_v39 = vld [vmem:[#allocation7] ss:$8 sps:$4 sm:$0xff]  }
  0x65   :  { %791 = vmatprep.subr.bf16.mxu0 %v1560_v23  ;;  %v1671_v23 = vld [vmem:[#allocation5 + $0xc0] ss:$8 sps:$4 sm:$0xff]   ;;  %v1626_v42 = vld [vmem:[#allocation5 + $0x270] ss:$8 sps:$4 sm:$0xff]   ;;  %v1634_v43 = vld [vmem:[#allocation5 + $0x284] ss:$8 sps:$4 sm:$0xff]  }
  0x66   :  { %v1632_v46 = vld [vmem:[#allocation5 + $0x280] ss:$8 sps:$4 sm:$0xff]   ;;  %v1640_v47 = vld [vmem:[#allocation5 + $0x294] ss:$8 sps:$4 sm:$0xff]   ;;  %v1683_v12 = vld [vmem:[#allocation5 + $0x304] ss:$8 sps:$4 sm:$0xff]  }
  0x67   :  { %747 = vmatpush1.bf16.msra.mxu1 %v1629_v50  ;;  %v1646_v50 = vld [vmem:[#allocation5 + $0x2a4] ss:$8 sps:$4 sm:$0xff]   ;;  %v1714_v4 = vld [vmem:[#allocation7 + $0x84] ss:$8 sps:$4 sm:$0xff]  }
  0x68   :  { %792 = vmatpush1.bf16.msra.mxu0 %v1562_v27  ;;  %748 = vmatprep.subr.bf16.mxu1 %v1630_v51  ;;  %v1677_v27 = vld [vmem:[#allocation5 + $0xd0] ss:$8 sps:$4 sm:$0xff]   ;;  %v1697_v51 = vld [vmem:[#allocation7 + $0x30] ss:$8 sps:$4 sm:$0xff]   ;;  %v1676_v6 = vld [vmem:[#allocation5 + $0x2f4] ss:$8 sps:$4 sm:$0xff]  }
  0x69   :  { %793 = vmatprep.subr.bf16.mxu0 %v1563_v32  ;;  %v1614_v32 = vld [vmem:[#allocation5 + $0x250] ss:$8 sps:$4 sm:$0xff]  }
  0x6b   :  { %749 = vmatpush1.bf16.msra.mxu1 %v1635_v54  ;;  %v1652_v54 = vld [vmem:[#allocation5 + $0x2b4] ss:$8 sps:$4 sm:$0xff]  }
  0x6c   :  { %794 = vmatpush1.bf16.msra.mxu0 %v1565_v36  ;;  %750 = vmatprep.subr.bf16.mxu1 %v1636_v55  ;;  %v1690_v36 = vld [vmem:[#allocation7 + $0x4] ss:$8 sps:$4 sm:$0xff]   ;;  %v1700_v55 = vld [vmem:[#allocation7 + $0x40] ss:$8 sps:$4 sm:$0xff]  }
  0x6d   :  { %795 = vmatprep.subr.bf16.mxu0 %v1566_v37  ;;  %v1620_v37 = vld [vmem:[#allocation5 + $0x260] ss:$8 sps:$4 sm:$0xff]  }
  0x6f   :  { %751 = vmatpush1.bf16.msra.mxu1 %v1641_v58  ;;  %v1658_v58 = vld [vmem:[#allocation5 + $0x2c4] ss:$8 sps:$4 sm:$0xff]  }
  0x70   :  { %796 = vmatpush1.bf16.msra.mxu0 %v1568_v40  ;;  %752 = vmatprep.subr.bf16.mxu1 %v1642_v59  ;;  %v125_v40 = vpack.c.bf16 %v1981_v21, %v1981_v21  ;;  %v1699_v21 = vld [vmem:[#allocation7 + $0x34] ss:$8 sps:$4 sm:$0xff]   ;;  %v1703_v59 = vld [vmem:[#allocation7 + $0x50] ss:$8 sps:$4 sm:$0xff]  }
  0x71   :  { %797 = vmatprep.subr.bf16.mxu0 %v1569_v41  ;;  %v1693_v41 = vld [vmem:[#allocation7 + $0x14] ss:$8 sps:$4 sm:$0xff]  }
  0x73   :  { %753 = vmatpush1.bf16.msra.mxu1 %v1647_v62  ;;  %v1664_v62 = vld [vmem:[#allocation5 + $0x2d4] ss:$8 sps:$4 sm:$0xff]  }
  0x74   :  { %798 = vmatpush1.bf16.msra.mxu0 %v1571_v44  ;;  %754 = vmatprep.subr.bf16.mxu1 %v1648_v63  ;;  %v1691_v44 = vld [vmem:[#allocation7 + $0x10] ss:$8 sps:$4 sm:$0xff]   ;;  %v1706_v63 = vld [vmem:[#allocation7 + $0x60] ss:$8 sps:$4 sm:$0xff]  }
  0x75   :  { %799 = vmatprep.subr.bf16.mxu0 %v1572_v45  ;;  %v1696_v45 = vld [vmem:[#allocation7 + $0x24] ss:$8 sps:$4 sm:$0xff]  }
  0x77   :  { %755 = vmatpush1.bf16.msra.mxu1 %v1653_v2  ;;  %v1670_v2 = vld [vmem:[#allocation5 + $0x2e4] ss:$8 sps:$4 sm:$0xff]  }
  0x78   :  { %800 = vmatpush1.bf16.msra.mxu0 %v1574_v48  ;;  %756 = vmatprep.subr.bf16.mxu1 %v1654_v3  ;;  %v1694_v48 = vld [vmem:[#allocation7 + $0x20] ss:$8 sps:$4 sm:$0xff]   ;;  %v1709_v3 = vld [vmem:[#allocation7 + $0x70] ss:$8 sps:$4 sm:$0xff]  }
  0x79   :  { %801 = vmatprep.subr.bf16.mxu0 %v1575_v49  ;;  %v1638_v49 = vld [vmem:[#allocation5 + $0x290] ss:$8 sps:$4 sm:$0xff]  }
  0x7b   :  { %757 = vmatpush1.bf16.msra.mxu1 %v1659_v10  ;;  %v1674_v10 = vld [vmem:[#allocation5 + $0x2f0] ss:$8 sps:$4 sm:$0xff]  }
  0x7c   :  { %802 = vmatpush1.bf16.msra.mxu0 %v1577_v52  ;;  %758 = vmatprep.subr.bf16.mxu1 %v1660_v13  ;;  %v1702_v52 = vld [vmem:[#allocation7 + $0x44] ss:$8 sps:$4 sm:$0xff]   ;;  %v1715_v13 = vld [vmem:[#allocation7 + $0x90] ss:$8 sps:$4 sm:$0xff]  }
  0x7d   :  { %803 = vmatprep.subr.bf16.mxu0 %v1578_v53  ;;  %v1644_v53 = vld [vmem:[#allocation5 + $0x2a0] ss:$8 sps:$4 sm:$0xff]  }
  0x7f   :  { %759 = vmatpush1.bf16.msra.mxu1 %v1665_v19  ;;  %v1718_v19 = vld [vmem:[#allocation7 + $0xa0] ss:$8 sps:$4 sm:$0xff]  }
  0x80   :  { %804 = vmatpush1.bf16.msra.mxu0 %v1580_v56  ;;  %760 = vmatprep.subr.bf16.mxu1 %v1666_v20  ;;  %v1705_v56 = vld [vmem:[#allocation7 + $0x54] ss:$8 sps:$4 sm:$0xff]  }
  0x81   :  { %805 = vmatprep.subr.bf16.mxu0 %v1581_v57  ;;  %v1650_v57 = vld [vmem:[#allocation5 + $0x2b0] ss:$8 sps:$4 sm:$0xff]   ;;  %v1723_v20 = vld [vmem:[#allocation7 + $0xb4] ss:$8 sps:$4 sm:$0xff]  }
  0x83   :  { %761 = vmatpush1.bf16.msra.mxu1 %v1671_v23  ;;  %v1726_v23 = vld [vmem:[#allocation7 + $0xc4] ss:$8 sps:$4 sm:$0xff]  }
  0x84   :  { %806 = vmatpush1.bf16.msra.mxu0 %v1583_v60  ;;  %762 = vmatprep.subr.bf16.mxu1 %v1672_v24  ;;  %v1708_v60 = vld [vmem:[#allocation7 + $0x64] ss:$8 sps:$4 sm:$0xff]   ;;  %v1724_v24 = vld [vmem:[#allocation7 + $0xc0] ss:$8 sps:$4 sm:$0xff]  }
  0x85   :  { %807 = vmatprep.subr.bf16.mxu0 %v1584_v61  ;;  %v1656_v61 = vld [vmem:[#allocation5 + $0x2c0] ss:$8 sps:$4 sm:$0xff]  }
  0x87   :  { %763 = vmatpush1.bf16.msra.mxu1 %v1677_v27  ;;  %v1732_v27 = vld [vmem:[#allocation7 + $0xe4] ss:$8 sps:$4 sm:$0xff]  }
  0x88   :  { %808 = vmatpush1.bf16.msra.mxu0 %v1586_v0  ;;  %764 = vmatprep.subr.bf16.mxu1 %v1679_v28  ;;  %v1711_v0 = vld [vmem:[#allocation7 + $0x74] ss:$8 sps:$4 sm:$0xff]   ;;  %v1730_v28 = vld [vmem:[#allocation7 + $0xe0] ss:$8 sps:$4 sm:$0xff]  }
  0x89   :  { %818 = vmatprep.subr.bf16.mxu0 %v1590_v1  ;;  %v1662_v1 = vld [vmem:[#allocation5 + $0x2d0] ss:$8 sps:$4 sm:$0xff]  }
  0x8b   :  { %810 = vmatmul.mubr.bf16.vlgmr.msra.gmra.mrb[0].mxu0 %v127_v5  ;;  %765 = vmatpush1.bf16.msra.mxu1 %v1684_v31  ;;  %v1668_v5 = vld [vmem:[#allocation5 + $0x2e0] ss:$8 sps:$4 sm:$0xff]   ;;  %v1736_v31 = vld [vmem:[#allocation8 + $0x40] sm:$0xff]  }
  0x8c   :  { %819 = vmatpush1.bf16.msra.mxu0 %v1588_v8  ;;  %850 = vmatprep.mubr.bf16.mxu0 %v130_v14  ;;  %v1712_v8 = vld [vmem:[#allocation7 + $0x80] ss:$8 sps:$4 sm:$0xff]   ;;  %v1720_v14 = vld [vmem:[#allocation7 + $0xa4] ss:$8 sps:$4 sm:$0xff]  }
  0x8d   :  { %820 = vmatprep.subr.bf16.mxu0 %v1593_v9  ;;  %766 = vmatprep.subr.bf16.mxu1 %v1685_v33  ;;  %v1717_v9 = vld [vmem:[#allocation7 + $0x94] ss:$8 sps:$4 sm:$0xff]  }
  0x8f   :  { %767 = vmatpush1.bf16.msra.mxu1 %v1687_v35  ;;  %v234_v35 = vsub.s32 0, %v1975_v15 }
  0x90   :  { %821 = vmatpush1.bf16.msra.mxu0 %v1591_v16  ;;  %1108 = vmatprep.subr.bf16.mxu1 %v1690_v36  ;;  %v129_v16 = vpack.c.bf16 %v1993_v7, %v1993_v7  ;;  %v131_v7 = vpack.c.bf16 %v1996_v11, %v1996_v11  ;;  %v230_v36 = vld [vmem:[%s2031_s2] sm:$0x3] }
  0x91   :  { %822 = vmatprep.subr.bf16.mxu0 %v1598_v17  ;;  %v1681_v17 = vld [vmem:[#allocation5 + $0x300] ss:$8 sps:$4 sm:$0xff]  }
  0x92   :  { %769 = vmatmul.mubr.bf16.vlgmr.msra.gmra.mrb[0].mxu1 %v125_v40 }
  0x93   :  { %1109 = vmatpush1.bf16.msra.mxu1 %v1688_v39 }
  0x94   :  { %823 = vmatpush1.bf16.msra.mxu0 %v1596_v22  ;;  %1110 = vmatprep.subr.bf16.mxu1 %v1693_v41  ;;  %v1879_v22 = vmov 0  }
  0x95   :  { %824 = vmatprep.subr.bf16.mxu0 %v1604_v18  ;;  %v1721_v18 = vld [vmem:[#allocation7 + $0xb0] ss:$8 sps:$4 sm:$0xff]  }
  0x97   :  { %1111 = vmatpush1.bf16.msra.mxu1 %v1691_v44 }
  0x98   :  { %825 = vmatpush1.bf16.msra.mxu0 %v1602_v25  ;;  %1112 = vmatprep.subr.bf16.mxu1 %v1696_v45  ;;  %v1727_v25 = vld [vmem:[#allocation7 + $0xd0] ss:$8 sps:$4 sm:$0xff]  }
  0x99   :  { %826 = vmatprep.subr.bf16.mxu0 %v1610_v26  ;;  %v1729_v26 = vld [vmem:[#allocation7 + $0xd4] ss:$8 sps:$4 sm:$0xff]  }
  0x9b   :  { %1113 = vmatpush1.bf16.msra.mxu1 %v1694_v48 }
  0x9c   :  { %827 = vmatpush1.bf16.msra.mxu0 %v1608_v29  ;;  %1114 = vmatprep.subr.bf16.mxu1 %v1699_v21  ;;  %v1735_v29 = vld [vmem:[#allocation7 + $0xf4] ss:$8 sps:$4 sm:$0xff]  }
  0x9d   :  { %828 = vmatprep.subr.bf16.mxu0 %v1616_v30  ;;  %v1733_v30 = vld [vmem:[#allocation7 + $0xf0] ss:$8 sps:$4 sm:$0xff]  }
  0x9f   :  { %1115 = vmatpush1.bf16.msra.mxu1 %v1697_v51 }
  0xa0   :  { %829 = vmatpush1.bf16.msra.mxu0 %v1614_v32  ;;  %1116 = vmatprep.subr.bf16.mxu1 %v1702_v52  ;;  %v1738_v52 = vld [vmem:[#allocation8 + $0x48] sm:$0xff]  }
  0xa1   :  { %830 = vmatprep.subr.bf16.mxu0 %v1622_v34 }
  0xa3   :  { %1117 = vmatpush1.bf16.msra.mxu1 %v1700_v55  ;;  %v1742_v55 = vld [vmem:[#allocation8 + $0x58] sm:$0xff]  }
  0xa4   :  { %831 = vmatpush1.bf16.msra.mxu0 %v1620_v37  ;;  %1118 = vmatprep.subr.bf16.mxu1 %v1705_v56  ;;  %v238_v37 = vsub.s32 1, %v1975_v15  ;;  %v1739_v15 = vld [vmem:[#allocation8 + $0x8] sm:$0xff]   ;;  %v1743_v56 = vld [vmem:[#allocation8 + $0x18] sm:$0xff]  }
  0xa5   :  { %832 = vmatprep.subr.bf16.mxu0 %v1628_v38  ;;  %v235_v38 = vrot.slane %v230_v36, %v234_v35 }
  0xa6   :  { %v239_v39 = vrot.slane %v230_v36, %v238_v37 }
  0xa7   :  { %1119 = vmatpush1.bf16.msra.mxu1 %v1703_v59  ;;  %v1746_v59 = vld [vmem:[#allocation8 + $0x68] sm:$0xff]  }
  0xa8   :  { %833 = vmatpush1.bf16.msra.mxu0 %v1626_v42  ;;  %1120 = vmatprep.subr.bf16.mxu1 %v1708_v60  ;;  %v1747_v60 = vld [vmem:[#allocation8 + $0x28] sm:$0xff]  }
  0xa9   :  { %834 = vmatprep.subr.bf16.mxu0 %v1634_v43 }
  0xab   :  { %1121 = vmatpush1.bf16.msra.mxu1 %v1706_v63  ;;  %v1750_v63 = vld [vmem:[#allocation8 + $0x78] sm:$0xff]  }
  0xac   :  { %835 = vmatpush1.bf16.msra.mxu0 %v1632_v46  ;;  %1122 = vmatprep.subr.bf16.mxu1 %v1711_v0  ;;  %v1751_v0 = vld [vmem:[#allocation8 + $0x38] sm:$0xff]  }
  0xad   :  { %836 = vmatprep.subr.bf16.mxu0 %v1640_v47 }
  0xaf   :  { %1123 = vmatpush1.bf16.msra.mxu1 %v1709_v3 }
  0xb0   :  { %837 = vmatpush1.bf16.msra.mxu0 %v1638_v49  ;;  %1124 = vmatprep.subr.bf16.mxu1 %v1714_v4 }
  0xb1   :  { %838 = vmatprep.subr.bf16.mxu0 %v1646_v50  ;;  %v1737_v50 = vld [vmem:[#allocation8] sm:$0xff]  }
  0xb3   :  { %1125 = vmatpush1.bf16.msra.mxu1 %v1712_v8 }
  0xb4   :  { %839 = vmatpush1.bf16.msra.mxu0 %v1644_v53  ;;  %1126 = vmatprep.subr.bf16.mxu1 %v1717_v9  ;;  %v1740_v53 = vld [vmem:[#allocation8 + $0x50] sm:$0xff]  }
  0xb5   :  { %840 = vmatprep.subr.bf16.mxu0 %v1652_v54  ;;  %v1741_v54 = vld [vmem:[#allocation8 + $0x10] sm:$0xff]  }
  0xb7   :  { %1127 = vmatpush1.bf16.msra.mxu1 %v1715_v13 }
  0xb8   :  { %841 = vmatpush1.bf16.msra.mxu0 %v1650_v57  ;;  %1128 = vmatprep.subr.bf16.mxu1 %v1720_v14  ;;  %v1744_v57 = vld [vmem:[#allocation8 + $0x60] sm:$0xff]  }
  0xb9   :  { %842 = vmatprep.subr.bf16.mxu0 %v1658_v58  ;;  %v1745_v58 = vld [vmem:[#allocation8 + $0x20] sm:$0xff]  }
  0xbb   :  { %1129 = vmatpush1.bf16.msra.mxu1 %v1718_v19  ;;  %v1477_v19 = vld [vmem:[%s2035_s6] ss:$0 sm:$0xff] }
  0xbc   :  { %843 = vmatpush1.bf16.msra.mxu0 %v1656_v61  ;;  %1130 = vmatprep.subr.bf16.mxu1 %v1723_v20  ;;  %v1748_v61 = vld [vmem:[#allocation8 + $0x70] sm:$0xff]  }
  0xbd   :  { %844 = vmatprep.subr.bf16.mxu0 %v1664_v62  ;;  %v1749_v62 = vld [vmem:[#allocation8 + $0x30] sm:$0xff]  }
  0xbf   :  { %1131 = vmatpush1.bf16.msra.mxu1 %v1721_v18 }
  0xc0   :  { %845 = vmatpush1.bf16.msra.mxu0 %v1662_v1  ;;  %1132 = vmatprep.subr.bf16.mxu1 %v1726_v23  ;;  %v936_v1 = vld [vmem:[%s2033_s4] sm:$0x3]  ;;  %s1880_s4 = smov [#allocation10]  }
  0xc1   :  { %846 = vmatprep.subr.bf16.mxu0 %v1670_v2  ;;  %v941_v2 = vrot.slane %v936_v1, %v234_v35  ;;  %v945_v3 = vrot.slane %v936_v1, %v238_v37  ;;  %s1335_s30 = sshll.u32 %s1880_s4, 4  ;;  %s1336_s30 = int_to_ptr.vmem [resolvable:$true] %s1335_s30 }
  0xc2   :  { %s1840_s8 = scalar_lea.vmem %s1336_s30, 32  ;;  %p1845_p5 = scmp.lt.s32.totalorder %s1336_s30, %s1336_s30 }
  0xc3   :  { %1133 = vmatpush1.bf16.msra.mxu1 %v1724_v24  ;;  %p1841_p4 = scmp.ne.s32.totalorder %s1336_s30, %s1840_s8  ;;  %p1846_p6 = scmp.lt.s32.totalorder %s1840_s8, %s1840_s8 }
  0xc4   :  { %847 = vmatpush1.bf16.msra.mxu0 %v1668_v5  ;;  %1134 = vmatprep.subr.bf16.mxu1 %v1729_v26 }
  0xc5   :  { %848 = vmatprep.subr.bf16.mxu0 %v1676_v6  ;;  %p1847_p7 = por %p1846_p6, %p1845_p5 }
  0xc7   :  { %1135 = vmatpush1.bf16.msra.mxu1 %v1727_v25  ;;  %p1848_p8 = pnand %p1847_p7, %p1841_p4 }
  0xc8   :  { %849 = vmatpush1.bf16.msra.mxu0 %v1674_v10  ;;  %1136 = vmatprep.subr.bf16.mxu1 %v1732_v27 }
  0xc9   :  { %859 = vmatprep.subr.bf16.mxu0 %v1683_v12 }
  0xcb   :  { %851 = vmatmul.mubr.bf16.vlgmr.msra.gmra.mrb[0].mxu0 %v129_v16  ;;  %1137 = vmatpush1.bf16.msra.mxu1 %v1730_v28 }
  0xcc   :  { %860 = vmatpush1.bf16.msra.mxu0 %v1681_v17  ;;  %891 = vmatprep.mubr.bf16.mxu0 %v1879_v22 }
  0xcd   :  { %1138 = vmatprep.subr.bf16.mxu1 %v1735_v29 }
  0xcf   :  { %1139 = vmatpush1.bf16.msra.mxu1 %v1733_v30 }
  0xd0   :  { %1494 = vmatprep.subr.bf16.mxu1 %v1736_v31 }
  0xd7   :  { %1444 = vmatmul.mubr.msk.bf16.vlgmr.msra.gmra.mrb[0].mxu0 %vm732_vm0, %v131_v7 }
 0x165   :  { %v770_v32 = vpop.f32.mrb[0].mxu1 }
 0x166   :  { %v772_v33 = vpop.f32.mrb[1].mxu1  ;;  %v771_v40 = vadd.f32 %v770_v32, %v235_v38 }
 0x167   :  { %v774_v11 = vpop.f32.mrb[2].mxu1  ;;  %v773_v41 = vadd.f32 %v772_v33, %v239_v39 }
 0x168   :  { %v775_v34 = vpop.f32.mrb[3].mxu1 }
 0x1aa   :  { %v893_v42 = vpop.f32.mrb[0].mxu0 }
 0x1ab   :  { %v1517_v43 = vadd.f32 %v893_v42, %v771_v40  ;;  %v895_v44 = vpop.f32.mrb[1].mxu0 }
 0x1ac   :  { %v1519_v45 = vadd.f32 %v895_v44, %v773_v41  ;;  %v897_v46 = vpop.f32.mrb[2].mxu0 }
 0x1ad   :  { %v900_v47 = vmax.f32 %v1517_v43, 0.0  ;;  %v898_v48 = vpop.f32.mrb[3].mxu0 }
 0x1ae   :  { %v901_v21 = vmax.f32 %v1519_v45, 0.0 }
 0x1af   :  { %v902_v51 = vpack.c.bf16 %v900_v47, %v900_v47 }
 0x1b0   :  { %v903_v49 = vpack.c.bf16 %v901_v21, %v901_v21 }
 0x1b2   :  { %1140 = vmatprep.mubr.bf16.mxu1 %v903_v49 }
 0x1b3   :  { %1141 = vmatmul.mubr.bf16.vlgmr.msra.gmra.mrb[4].mxu1 %v902_v51 }
 0x1b4   :  { %1495 = vmatpush3.bf16.msra.mxu1 %v1737_v50 }
 0x1b5   :  { %1496 = vmatprep.subr.bf16.mxu1 %v1738_v52 }
 0x1b8   :  { %1497 = vmatpush3.bf16.msra.mxu1 %v1739_v15 }
 0x1b9   :  { %1498 = vmatprep.subr.bf16.mxu1 %v1740_v53 }
 0x1bc   :  { %1499 = vmatpush3.bf16.msra.mxu1 %v1741_v54 }
 0x1bd   :  { %1500 = vmatprep.subr.bf16.mxu1 %v1742_v55 }
 0x1c0   :  { %1501 = vmatpush3.bf16.msra.mxu1 %v1743_v56 }
 0x1c1   :  { %1502 = vmatprep.subr.bf16.mxu1 %v1744_v57 }
 0x1c4   :  { %1503 = vmatpush3.bf16.msra.mxu1 %v1745_v58 }
 0x1c5   :  { %1504 = vmatprep.subr.bf16.mxu1 %v1746_v59 }
 0x1c8   :  { %1505 = vmatpush3.bf16.msra.mxu1 %v1747_v60 }
 0x1c9   :  { %1506 = vmatprep.subr.bf16.mxu1 %v1748_v61 }
 0x1cc   :  { %1507 = vmatpush3.bf16.msra.mxu1 %v1749_v62 }
 0x1cd   :  { %1508 = vmatprep.subr.bf16.mxu1 %v1750_v63 }
 0x1d0   :  { %1509 = vmatpush3.bf16.msra.mxu1 %v1751_v0 }
 0x286   :  { %v1142_v4 = vpop.f32.mrb[4].mxu1 }
 0x287   :  { %v1143_v5 = vadd.f32 %v1142_v4, %v941_v2  ;;  %v1144_v6 = vpop.f32.mrb[5].mxu1 }
 0x288   :  { %v1145_v8 = vadd.f32 %v1144_v6, %v945_v3  ;;  %v1146_v9 = vpop.f32.mrb[6].mxu1 }
 0x289   :  { %v1149_v10 = vmax.f32 %v1143_v5, 0.0  ;;  %v1147_v12 = vpop.f32.mrb[7].mxu1 }
 0x28a   :  { %v1150_v13 = vmax.f32 %v1145_v8, 0.0 }
 0x28b   :  { %v1151_v16 = vpack.c.bf16 %v1149_v10, %v1149_v10 }
 0x28c   :  { %v1152_v14 = vpack.c.bf16 %v1150_v13, %v1150_v13 }
 0x28e   :  { %1320 = vmatprep.mubr.bf16.mxu1 %v1152_v14 }
 0x28f   :  { %1321 = vmatmul.mubr.bf16.vlgmr.msra.gmra.mrb[8].mxu1 %v1151_v16 }
 0x362   :  { %v1510_v17 = vpop.f32.mrb[8].mxu1 }
 0x363   :  { %v1511_v20 = vpop.f32.mrb[9].mxu1 }
 0x364   :  { %v1512_v22 = vadd.f32 %v1511_v20, %v1510_v17  ;;  %v1513_v18 = vpop.f32.mrb[10].mxu1 }
 0x365   :  { %v1514_v23 = vpop.f32.mrb[11].mxu1 }
 0x366   :  { %v1323_v24 = vadd.f32 %v1512_v22, %v1477_v19 }
 0x368   :  { %1328 = vst [vmem:[#allocation10] sm:$0x3] %v1323_v24 }
 0x369   :  { %1851 = shalt.err (!%p1848_p8)
}
 0x36a   :  { %s1852_s6 = scalar_lea.hbm %s2036_s7, 32 }
 0x36b   :  { %p1853_p9 = scmp.ne.s32.totalorder %s2036_s7, %s1852_s6  ;;  %p1856_p10 = scmp.lt.u32.totalorder %s1852_s6, %s2036_s7 }
 0x36d   :  { %p1858_p11 = pnand %p1856_p10, %p1853_p9 }
 0x36f   :  { %1861 = shalt.err (!%p1858_p11)
}
 0x370   :  { %1338 = dma.vmem_to_hbm [thread:$0]  %s1336_s30, 32, %s2036_s7, [#allocation4]  }
 0x371   :  { %1868 = dma.done.wait [#allocation4], 32  }
 0x372   :  { %1869 = vsyncadd [#allocation4], 4294967264 }
 0x373   :  { %1342 = vsyncpa [#allocation3], 1 }
 0x374   :  { %1343 = vsyncpa [#allocation6], 1 }
 0x375   :  { %1344 = vsyncpa [#allocation9], 1 }
 0x376   :  { %1345 = vsyncpa [#allocation4], 1 }

</bundles_post_ra>
